<compile_context>
chip_gen: v6e
topology: v6e:2x2x1
jax: 0.10.0
libtpu: 0.0.40
codegen_flags: <defaults>
</compile_context>

<pallas_src>
import functools

import jax
import jax.numpy as jnp
from jax.experimental import pallas as pl
from jax.experimental.pallas import tpu as pltpu


# ----------------------------------------------------------------------------
# Fused MHSA kernel: B_blk batch elements per grid step, all heads inside.
# Channel-major layout: x block is (B_blk, C, N); output block is (B_blk, C, N).
# ----------------------------------------------------------------------------
def _mhsa_kernel(x_ref, wqkv_ref, bqkv_ref, wproj_ref, bproj_ref, o_ref, *,
                 num_heads, head_dim, scale, use_bf16):
    C = num_heads * head_dim
    b_blk, _, n = x_ref.shape

    def mx(a):
        # Cast MXU operands to bf16 only when it actually pays off (gated by
        # the wrapper on C >= 128); accumulation stays f32 either way.
        return a.astype(jnp.bfloat16) if use_bf16 else a

    # Weights / biases loaded once per grid step (resident across the batch
    # grid via constant index_maps in the BlockSpecs).
    w_qkv = mx(wqkv_ref[...])                              # (3C, C)
    w_proj = mx(wproj_ref[...])                            # (C, C)
    b_qkv = bqkv_ref[...].astype(jnp.float32)              # (3C, 1) lane-bcast
    b_proj = bproj_ref[...].astype(jnp.float32)            # (C, 1)  lane-bcast

    # Static (unrolled) loop over the batch elements in this block.
    for b in range(b_blk):
        x = mx(x_ref[b])                                   # (C, N)

        # --- QKV projection (channel-major): (3C, C) @ (C, N) -> (3C, N) -----
        qkv = jnp.dot(w_qkv, x, preferred_element_type=jnp.float32)
        qkv = qkv + b_qkv                                  # (3C, N), f32

        # --- head split: rows [0,C)=q, [C,2C)=k, [2C,3C)=v; hd rows per head -
        q = qkv[0:C].reshape(num_heads, head_dim, n) * scale   # (nh, hd, N)
        k = qkv[C:2 * C].reshape(num_heads, head_dim, n)        # (nh, hd, N)
        v = qkv[2 * C:3 * C].reshape(num_heads, head_dim, n)    # (nh, hd, N)

        # --- attention scores: contract head_dim directly (no q transpose) ---
        s = jnp.einsum('hdq,hdk->hqk', mx(q), mx(k),
                       preferred_element_type=jnp.float32)      # (nh, N, N)

        # --- softmax (f32, max-subtracted) ------------------------------------
        s = s - jnp.max(s, axis=-1, keepdims=True)
        p = jnp.exp(s)
        denom = jnp.sum(p, axis=-1, keepdims=True)
        p = p * pl.reciprocal(denom, approx=True)          # EUP, not VPU divide

        # --- attn @ v, directly in channel-major form: (nh, hd, N) ------------
        o = jnp.einsum('hdk,hqk->hdq', mx(v), mx(p),
                       preferred_element_type=jnp.float32)      # (nh, hd, N)
        o = o.reshape(C, n)                                # head merge (free)

        # --- output projection: (C, C) @ (C, N) + b ----------------------------
        out = jnp.dot(w_proj, mx(o), preferred_element_type=jnp.float32)
        out = out + b_proj

        o_ref[b] = out.astype(o_ref.dtype)


def _pick_batch_block(B):
    """Largest divisor of B that is <= 8, while keeping >= 2 grid steps when
    B >= 2 (so both v7x TensorCores get work)."""
    max_blk = min(B, 8)
    if B >= 2:
        max_blk = min(max_blk, B // 2)
    for d in range(max_blk, 0, -1):
        if B % d == 0:
            return d
    return 1


def mhsa_forward(x, params, head_dim, *, mxu_dtype=None, batch_block=None):
    """x: (B, C, H, W) NCHW -> (B, C, H, W), matching the PyTorch MHSA module."""
    B, C, H, W = x.shape
    N = H * W
    num_heads = C // head_dim
    scale = head_dim ** (-0.5)

    # bf16 MXU operands only pay off once the contraction dim saturates the MXU
    # (roughly C >= 128); otherwise the casts are pure extra VALU work
    # (especially on v5e, which has no bf16 VPU support).
    use_bf16 = (mxu_dtype == jnp.bfloat16) and (C >= 128)

    if batch_block is None:
        batch_block = _pick_batch_block(B)
    assert B % batch_block == 0
    num_blocks = B // batch_block

    # Free reshape (no data movement): stay channel-major all the way.
    x_flat = x.reshape(B, C, N)

    kernel = functools.partial(
        _mhsa_kernel,
        num_heads=num_heads,
        head_dim=head_dim,
        scale=scale,
        use_bf16=use_bf16,
    )

    # Advisory cost estimate so XLA schedules surrounding ops sensibly.
    flops = 2 * B * (3 * C * C * N + 2 * num_heads * N * N * head_dim + C * C * N)
    itemsize = jnp.dtype(x.dtype).itemsize
    bytes_accessed = (2 * B * C * N                    # x in + out
                      + 3 * C * C + 3 * C              # qkv weight + bias
                      + C * C + C) * itemsize          # proj weight + bias
    cost = pl.CostEstimate(flops=flops,
                           transcendentals=B * num_heads * N * N,
                           bytes_accessed=bytes_accessed)

    out = pl.pallas_call(
        kernel,
        out_shape=jax.ShapeDtypeStruct((B, C, N), x.dtype),
        grid=(num_blocks,),
        in_specs=[
            pl.BlockSpec((batch_block, C, N), lambda b: (b, 0, 0)),   # x block
            pl.BlockSpec((3 * C, C), lambda b: (0, 0)),               # W_qkv (resident)
            pl.BlockSpec((3 * C, 1), lambda b: (0, 0)),               # b_qkv (resident)
            pl.BlockSpec((C, C), lambda b: (0, 0)),                   # W_proj (resident)
            pl.BlockSpec((C, 1), lambda b: (0, 0)),                   # b_proj (resident)
        ],
        out_specs=pl.BlockSpec((batch_block, C, N), lambda b: (b, 0, 0)),
        compiler_params=pltpu.CompilerParams(
            dimension_semantics=("parallel",)),
        cost_estimate=cost,
    )(x_flat, params["w_qkv"], params["b_qkv"],
      params["w_proj"], params["b_proj"])

    return out.reshape(B, C, H, W)


def init_params(key, dim, qkv_bias=False, dtype=jnp.float32):
    """Synthetic params; weights kept in the PyTorch nn.Linear (out, in) layout."""
    k1, k2, k3 = jax.random.split(key, 3)
    bound = 1.0 / (dim ** 0.5)
    w_qkv = jax.random.uniform(k1, (3 * dim, dim), dtype, -bound, bound)
    w_proj = jax.random.uniform(k2, (dim, dim), dtype, -bound, bound)
    b_proj = jax.random.uniform(k3, (dim,), dtype, -bound, bound)
    b_qkv = jnp.zeros((3 * dim,), dtype)  # qkv_bias=False -> zeros
    return {
        "w_qkv": w_qkv,                         # (3C, C)
        "b_qkv": b_qkv.reshape(3 * dim, 1),     # (3C, 1) column vector
        "w_proj": w_proj,                       # (C, C)
        "b_proj": b_proj.reshape(dim, 1),       # (C, 1) column vector
    }


def _reference(x, params, head_dim):
    """Pure-JAX reference replicating the PyTorch forward exactly."""
    B, C, H, W = x.shape
    N = H * W
    nh = C // head_dim
    scale = head_dim ** (-0.5)
    xs = jnp.transpose(x.reshape(B, C, N), (0, 2, 1))                  # (B,N,C)
    qkv = xs @ params["w_qkv"].T + params["b_qkv"].reshape(1, 1, 3 * C)
    qkv = jnp.transpose(qkv.reshape(B, N, 3, nh, head_dim), (2, 0, 3, 1, 4))
    q, k, v = qkv[0], qkv[1], qkv[2]
    attn = jax.nn.softmax((q * scale) @ jnp.swapaxes(k, -2, -1), axis=-1)
    out = jnp.transpose(attn @ v, (0, 2, 1, 3)).reshape(B, N, C)
    out = out @ params["w_proj"].T + params["b_proj"].reshape(1, C)
    return jnp.transpose(out, (0, 2, 1)).reshape(B, C, H, W)


if __name__ == "__main__":
    key = jax.random.PRNGKey(0)
    kx, kp, kx2 = jax.random.split(key, 3)

    # Small shapes consistent with the module: dim=32, head_dim=8 -> 4 heads.
    B, C, H, W = 2, 32, 8, 8
    head_dim = 8

    x = jax.random.normal(kx, (B, C, H, W), jnp.float32)
    params = init_params(kp, C, qkv_bias=False)

    # Default f32 path (B=2 -> batch_block=1, grid=(2,) so both v7x TCs work).
    out = mhsa_forward(x, params, head_dim)
    jax.block_until_ready(out)
    assert out.shape == (B, C, H, W), out.shape

    ref = _reference(x, params, head_dim)
    assert jnp.allclose(out, ref, atol=1e-2, rtol=1e-2), (
        float(jnp.max(jnp.abs(out - ref))))

    # Larger batch exercises the batch-blocked grid (B=8 -> batch_block=4,
    # grid=(2,), 4 batch elements fused per grid step).
    B2 = 8
    x2 = jax.random.normal(kx2, (B2, C, H, W), jnp.float32)
    out2 = mhsa_forward(x2, params, head_dim)
    jax.block_until_ready(out2)
    ref2 = _reference(x2, params, head_dim)
    assert jnp.allclose(out2, ref2, atol=1e-2, rtol=1e-2), (
        float(jnp.max(jnp.abs(out2 - ref2))))

    # Requesting bf16 MXU operands at C=32 is shape-gated back to f32 (no-op),
    # so results must match the f32 path exactly.
    out_gated = mhsa_forward(x, params, head_dim, mxu_dtype=jnp.bfloat16)
    jax.block_until_ready(out_gated)
    assert jnp.allclose(out_gated, ref, atol=1e-2, rtol=1e-2), (
        float(jnp.max(jnp.abs(out_gated - ref))))

    print("KERNEL_OK")
</pallas_src>

<mosaic_0001>
module attributes {stable_mosaic.version = 11 : i64} {
  func.func @_mhsa_kernel(%arg0: i32, %arg1: memref<1x32x64xf32, #tpu.memory_space<vmem>>, %arg2: memref<96x32xf32, #tpu.memory_space<vmem>>, %arg3: memref<96x1xf32, #tpu.memory_space<vmem>>, %arg4: memref<32x32xf32, #tpu.memory_space<vmem>>, %arg5: memref<32x1xf32, #tpu.memory_space<vmem>>, %arg6: memref<1x32x64xf32, #tpu.memory_space<vmem>>) attributes {dimension_semantics = [#tpu.dimension_semantics<parallel>], iteration_bounds = array<i64: 2>, scalar_prefetch = 0 : i64, scratch_operands = 0 : i64, tpu.core_type = #tpu.core_type<tc>, window_params = [{transform_indices = @transform_0, window_bounds = array<i64: 1, 32, 64>}, {pipeline_mode = #tpu.pipeline_mode<synchronous>, transform_indices = @transform_1, window_bounds = array<i64: 96, 32>}, {pipeline_mode = #tpu.pipeline_mode<synchronous>, transform_indices = @transform_2, window_bounds = array<i64: 96, 1>}, {pipeline_mode = #tpu.pipeline_mode<synchronous>, transform_indices = @transform_3, window_bounds = array<i64: 32, 32>}, {pipeline_mode = #tpu.pipeline_mode<synchronous>, transform_indices = @transform_4, window_bounds = array<i64: 32, 1>}, {transform_indices = @transform_5, window_bounds = array<i64: 1, 32, 64>}]} {
    %c0 = arith.constant 0 : index
    %c0_0 = arith.constant 0 : index
    %0 = vector.load %arg2[%c0, %c0_0] : memref<96x32xf32, #tpu.memory_space<vmem>>, vector<96x32xf32>
    %c0_1 = arith.constant 0 : index
    %c0_2 = arith.constant 0 : index
    %1 = vector.load %arg4[%c0_1, %c0_2] : memref<32x32xf32, #tpu.memory_space<vmem>>, vector<32x32xf32>
    %c0_3 = arith.constant 0 : index
    %c0_4 = arith.constant 0 : index
    %2 = vector.load %arg3[%c0_3, %c0_4] : memref<96x1xf32, #tpu.memory_space<vmem>>, vector<96x1xf32>
    %c0_5 = arith.constant 0 : index
    %c0_6 = arith.constant 0 : index
    %3 = vector.load %arg5[%c0_5, %c0_6] : memref<32x1xf32, #tpu.memory_space<vmem>>, vector<32x1xf32>
    %c0_7 = arith.constant 0 : index
    %c0_8 = arith.constant 0 : index
    %c0_9 = arith.constant 0 : index
    %4 = vector.load %arg1[%c0_7, %c0_8, %c0_9] : memref<1x32x64xf32, #tpu.memory_space<vmem>>, vector<1x32x64xf32>
    %5 = vector.shape_cast %4 : vector<1x32x64xf32> to vector<32x64xf32>
    %cst = arith.constant dense<0.000000e+00> : vector<96x64xf32>
    %6 = tpu.matmul %0, %5, %cst {dimension_numbers = #tpu.dot_dimension_numbers<[1], [0], [0], [1], [0, 0, 1, 1], [], []>} : vector<96x32xf32>, vector<32x64xf32>, vector<96x64xf32> -> vector<96x64xf32>
    %7 = vector.broadcast %2 : vector<96x1xf32> to vector<96x64xf32>
    %8 = arith.addf %6, %7 : vector<96x64xf32>
    %9 = vector.extract_strided_slice %8 {offsets = [0, 0], sizes = [32, 64], strides = [1, 1]} : vector<96x64xf32> to vector<32x64xf32>
    %10 = vector.shape_cast %9 : vector<32x64xf32> to vector<4x8x64xf32>
    %cst_10 = arith.constant 0.353553385 : f32
    %11 = vector.broadcast %cst_10 : f32 to vector<4x8x64xf32>
    %12 = arith.mulf %10, %11 : vector<4x8x64xf32>
    %13 = vector.extract_strided_slice %8 {offsets = [32, 0], sizes = [32, 64], strides = [1, 1]} : vector<96x64xf32> to vector<32x64xf32>
    %14 = vector.shape_cast %13 : vector<32x64xf32> to vector<4x8x64xf32>
    %15 = vector.extract_strided_slice %8 {offsets = [64, 0], sizes = [32, 64], strides = [1, 1]} : vector<96x64xf32> to vector<32x64xf32>
    %16 = vector.shape_cast %15 : vector<32x64xf32> to vector<4x8x64xf32>
    "tpu.trace_start"() <{level = 10 : i32, message = "hdq,hdk->hqk"}> : () -> ()
    %cst_11 = arith.constant dense<0.000000e+00> : vector<4x64x64xf32>
    %17 = tpu.matmul %12, %14, %cst_11 {dimension_numbers = #tpu.dot_dimension_numbers<[1], [1], [2], [2], [0, 0, 0, 2, 1, 2], [0], [0]>} : vector<4x8x64xf32>, vector<4x8x64xf32>, vector<4x64x64xf32> -> vector<4x64x64xf32>
    "tpu.trace_stop"() : () -> ()
    %cst_12 = arith.constant dense<0xFF800000> : vector<4x64xf32>
    %18 = vector.multi_reduction <maximumf>, %17, %cst_12 [2] : vector<4x64x64xf32> to vector<4x64xf32>
    %19 = vector.shape_cast %18 : vector<4x64xf32> to vector<4x64x1xf32>
    %20 = vector.broadcast %19 : vector<4x64x1xf32> to vector<4x64x64xf32>
    %21 = arith.subf %17, %20 : vector<4x64x64xf32>
    %22 = math.exp %21 : vector<4x64x64xf32>
    %cst_13 = arith.constant dense<0.000000e+00> : vector<4x64xf32>
    %23 = vector.multi_reduction <add>, %22, %cst_13 [2] : vector<4x64x64xf32> to vector<4x64xf32>
    %24 = vector.shape_cast %23 : vector<4x64xf32> to vector<4x64x1xf32>
    %25 = tpu.reciprocal %24 {approx = true} : vector<4x64x1xf32> -> vector<4x64x1xf32>
    %26 = vector.broadcast %25 : vector<4x64x1xf32> to vector<4x64x64xf32>
    %27 = arith.mulf %22, %26 : vector<4x64x64xf32>
    "tpu.trace_start"() <{level = 10 : i32, message = "hdk,hqk->hdq"}> : () -> ()
    %cst_14 = arith.constant dense<0.000000e+00> : vector<4x8x64xf32>
    %28 = tpu.matmul %16, %27, %cst_14 {dimension_numbers = #tpu.dot_dimension_numbers<[2], [2], [1], [1], [0, 0, 0, 1, 1, 1], [0], [0]>} : vector<4x8x64xf32>, vector<4x64x64xf32>, vector<4x8x64xf32> -> vector<4x8x64xf32>
    "tpu.trace_stop"() : () -> ()
    %29 = vector.shape_cast %28 : vector<4x8x64xf32> to vector<32x64xf32>
    %cst_15 = arith.constant dense<0.000000e+00> : vector<32x64xf32>
    %30 = tpu.matmul %1, %29, %cst_15 {dimension_numbers = #tpu.dot_dimension_numbers<[1], [0], [0], [1], [0, 0, 1, 1], [], []>} : vector<32x32xf32>, vector<32x64xf32>, vector<32x64xf32> -> vector<32x64xf32>
    %31 = vector.broadcast %3 : vector<32x1xf32> to vector<32x64xf32>
    %32 = arith.addf %30, %31 : vector<32x64xf32>
    %c0_16 = arith.constant 0 : index
    %c0_17 = arith.constant 0 : index
    %c0_18 = arith.constant 0 : index
    %33 = vector.load %arg6[%c0_16, %c0_17, %c0_18] : memref<1x32x64xf32, #tpu.memory_space<vmem>>, vector<1x32x64xf32>
    %34 = vector.shape_cast %33 : vector<1x32x64xf32> to vector<32x64xf32>
    %35 = vector.shape_cast %32 : vector<32x64xf32> to vector<1x32x64xf32>
    tpu.vector_store %arg6[%c0_16, %c0_17, %c0_18], %35 {strides = array<i32>} : memref<1x32x64xf32, #tpu.memory_space<vmem>>, vector<1x32x64xf32>,
    return
  }
  func.func @transform_0(%arg0: i32) -> (i32, i32, i32) {
    %c0_i32 = arith.constant 0 : i32
    %c0_i32_0 = arith.constant 0 : i32
    %c0_i32_1 = arith.constant 0 : i32
    return %arg0, %c0_i32, %c0_i32_0 : i32, i32, i32
  }
  func.func @transform_1(%arg0: i32) -> (i32, i32) {
    %c0_i32 = arith.constant 0 : i32
    %c0_i32_0 = arith.constant 0 : i32
    %c0_i32_1 = arith.constant 0 : i32
    return %c0_i32, %c0_i32_0 : i32, i32
  }
  func.func @transform_2(%arg0: i32) -> (i32, i32) {
    %c0_i32 = arith.constant 0 : i32
    %c0_i32_0 = arith.constant 0 : i32
    %c0_i32_1 = arith.constant 0 : i32
    return %c0_i32, %c0_i32_0 : i32, i32
  }
  func.func @transform_3(%arg0: i32) -> (i32, i32) {
    %c0_i32 = arith.constant 0 : i32
    %c0_i32_0 = arith.constant 0 : i32
    %c0_i32_1 = arith.constant 0 : i32
    return %c0_i32, %c0_i32_0 : i32, i32
  }
  func.func @transform_4(%arg0: i32) -> (i32, i32) {
    %c0_i32 = arith.constant 0 : i32
    %c0_i32_0 = arith.constant 0 : i32
    %c0_i32_1 = arith.constant 0 : i32
    return %c0_i32, %c0_i32_0 : i32, i32
  }
  func.func @transform_5(%arg0: i32) -> (i32, i32, i32) {
    %c0_i32 = arith.constant 0 : i32
    %c0_i32_0 = arith.constant 0 : i32
    %c0_i32_1 = arith.constant 0 : i32
    return %arg0, %c0_i32, %c0_i32_0 : i32, i32, i32
  }
}

</mosaic_0001>

<bundles_post_ra>
// kernel: tpu_custom_call.1
= control target key start
LH: loop header
LB: loop body
LE: loop exit
PB: predicated region body
PF: predicated region fallthrough
CT: control target
= control target key end

     0   :  { %10 = vsyncpa [#allocation3], 0  ;;  %s3411_s0 = inlined_call_operand.vmem [shape: f32[2,32,64], index: 0, kind: input, shape index: {}]   ;;  %s3412_s1 = inlined_call_operand.vmem [shape: f32[96,32], index: 1, kind: input, shape index: {}]   ;;  %s3413_s2 = inlined_call_operand.vmem [shape: f32[96,1], index: 2, kind: input, shape index: {}]   ;;  %s3414_s3 = inlined_call_operand.vmem [shape: f32[32,32], index: 3, kind: input, shape index: {}]   ;;  %s3415_s4 = inlined_call_operand.vmem [shape: f32[32,1], index: 4, kind: input, shape index: {}]   ;;  %s3416_s5 = inlined_call_operand.hbm [shape: f32[2,32,64], index: 5, kind: output, shape index: {}]  }
   0x1   :  { %12 = vsyncpa [#allocation3 + $0x1], 0  ;;  %s2714_s18 = smov 0   ;;  %s2716_s19 = smov 0  }
   0x2   :  { %s2718_s20 = smov 0   ;;  %s2720_s21 = smov 0  }
   0x3 LB: > { %s2735_s22 = sadd.s32 4294967295, %s2676_s21   ;;  %s2068_s23 = sadd.s32 4294967294, %s2676_s21   ;;  %s2676_s21 = sphi %s2720_s21, %s3422_s21   ;;  %s2672_s20 = sphi %s2718_s20, %s3421_s20   ;;  %s2668_s19 = sphi %s2716_s19, %s3420_s19   ;;  %s2664_s18 = sphi %s2714_s18, %s3419_s18  }
   0x4   : > { %s2739_s24 = sadd.s32 1, %s2676_s21   ;;  %s135_s25 = sadd.s32 1, %s2672_s20 }
   0x5   : > { %s132_s26 = ssub.s32 %s2676_s21, %s2739_s24  ;;  %p145_p0 = scmp.ne.s32.totalorder %s2672_s20, %s2668_s19 }
   0x6   : > { %p133_p1 = scmp.eq.s32.totalorder %s132_s26, 0  ;;  %p146_p2 = scmp.eq.s32.totalorder %s2735_s22, 1 }
   0x7   : > { %p151_p3 = scmp.ne.s32.totalorder %s2668_s19, %s2664_s18  ;;  %p152_p4 = scmp.eq.s32.totalorder %s2068_s23, 1 }
   0x8   : > { %s2750_s27 = scalar_select %p133_p1, %s2672_s20, %s135_s25  }
   0x9   : > { %p2752_p5 = por %p146_p2, %p145_p0  ;;  %p2756_p6 = por %p152_p4, %p151_p3 }
   0xa   : > { %p2071_p7 = scmp.ge.s32.totalorder %s2676_s21, 1  ;;  %p190_p8 = scmp.lt.s32.totalorder %s2676_s21, 3 }
   0xc   : > { %p191_p9 = pnand %p2071_p7, %p190_p8 }
   0xd   : > { %p218_p10 = scmp.lt.s32.totalorder (!%p191_p9), %s2735_s22, 1  ;;  %s215_s10 = sand.u32 (!%p191_p9), 1, %s2668_s19  }
   0xe   : > { %194 = sbr.rel (%p191_p9) target bundleno = 1485 (0x5cd), region = 40  ;;  %s2072_s11 = sshll.u32 (!%p191_p9), %s215_s10, 5 }
   0xf   : > { %s2165_s14 = sshll.u32 (!%p191_p9), %s2735_s22, 9  ;;  %s2681_s25 = smov (!%p191_p9), [#allocation2]  }
  0x10   : > { %s2620_s26 = sshll.u32 (!%p191_p9), %s2681_s25, 4  ;;  %s2621_s26 = int_to_ptr.vmem [resolvable:$false] %s2620_s26 }
  0x11   : > { %s2622_s30 = scalar_lea.vmem (!%p191_p9), %s2621_s26, 1024 }
  0x13   : > { %v223_v0 = vld [vmem:[%s3412_s1] sm:$0xff]  ;;  %vm319_vm0 = vcmask 261120   ;;  %v2678_v1 = vmov 0   ;;  %s219_s7 = scalar_select %p218_p10, %s2735_s22, 1  ;;  %v240_v4 = vld [vmem:[%s3413_s2 + $0x8] sm:$0xff]  ;;  %v242_v5 = vld [vmem:[%s3413_s2 + $0x18] sm:$0xff] }
  0x14   : > { %2270 = vmatprep.mubr.msk.f32.mxu0 %vm319_vm0, %v223_v0  ;;  %2486 = vset.pattern.permute.xlu0 %v2678_v1  ;;  %v239_v2 = vld [vmem:[%s3413_s2] sm:$0xff]  ;;  %v241_v9 = vld [vmem:[%s3413_s2 + $0x10] sm:$0xff]  ;;  %v244_v10 = vld [vmem:[%s3413_s2 + $0x28] sm:$0xff]  ;;  %vm517_vm1 = vcmask 64512   ;;  %vm1130_vm2 = vcmask 523264   ;;  %vm2680_vm3 = vmmov 0   ;;  %s3367_s22 = scalar_lea.hbm %s3416_s5, %s2165_s14 }
  0x15   : > { %2487 = vset.pattern.permute.xlu1 %v2678_v1  ;;  %261 = vperm.xlu0 %2486, %v239_v2   ;;  %v243_v3 = vld [vmem:[%s3413_s2 + $0x20] sm:$0xff]  ;;  %s2164_s12 = sshll.u32 %s219_s7, 5  ;;  %v224_v12 = vld [vmem:[%s3412_s1 + $0x8] sm:$0xff]  ;;  %v225_v13 = vld [vmem:[%s3412_s1 + $0x10] sm:$0xff] }
  0x16   : > { %281 = vperm.xlu1 %2487, %v243_v3   ;;  %s222_s17 = scalar_lea.vmem %s3411_s0, %s2164_s12  ;;  %v246_v14 = vld [vmem:[%s3413_s2 + $0x38] sm:$0xff]  ;;  %v227_v16 = vld [vmem:[%s3412_s1 + $0x20] sm:$0xff]  ;;  %v228_v17 = vld [vmem:[%s3412_s1 + $0x28] sm:$0xff]  ;;  %s217_s12 = scalar_lea.vmem [#allocation2], %s2072_s11 }
  0x17   : > { %v258_v6 = vld [vmem:[%s222_s17 + $0x18] sm:$0xff]  ;;  %v257_v7 = vld [vmem:[%s222_s17 + $0x10] sm:$0xff]  ;;  %v256_v8 = vld [vmem:[%s222_s17 + $0x8] sm:$0xff]  ;;  %s2006_s13 = sshll.u32 %s217_s12, 4  ;;  %s3360_s13 = int_to_ptr.vmem [resolvable:$true] %s2006_s13 }
  0x18   : > { %2262 = vmatprep.subr.mxu0 %v258_v6  ;;  %v255_v11 = vld [vmem:[%s222_s17] sm:$0xff]  ;;  %v226_v15 = vld [vmem:[%s3412_s1 + $0x18] sm:$0xff]  ;;  %v229_v18 = vld [vmem:[%s3412_s1 + $0x30] sm:$0xff]  ;;  %s3371_s17 = scalar_lea.sflag [#allocation3], %s215_s10  ;;  %s2616_s23 = scalar_lea.vmem %s3360_s13, 512 }
  0x19   : > { %266 = vperm.xlu0 %2486, %v240_v4   ;;  %2263 = vmatpush3.msra.mxu0 %v258_v6  ;;  %v230_v19 = vld [vmem:[%s3412_s1 + $0x38] sm:$0xff]  ;;  %v231_v41 = vld [vmem:[%s3412_s1 + $0x40] sm:$0xff]  ;;  %v232_v43 = vld [vmem:[%s3412_s1 + $0x48] sm:$0xff]  ;;  %p2617_p11 = scmp.ne.s32.totalorder %s3360_s13, %s2616_s23  ;;  %p2623_p0 = scmp.lt.s32.totalorder %s3360_s13, %s2621_s26 }
  0x1a   : > { %276 = vperm.xlu1 %2487, %v242_v5   ;;  %2264 = vmatprep.subr.mxu0 %v257_v7  ;;  %v233_v44 = vld [vmem:[%s3412_s1 + $0x50] sm:$0xff]  ;;  %v234_v45 = vld [vmem:[%s3412_s1 + $0x58] sm:$0xff]  ;;  %p2624_p1 = scmp.lt.s32.totalorder %s2622_s30, %s2616_s23 }
  0x1b   : > { %2265 = vmatpush3.msra.mxu0 %v257_v7  ;;  %v245_v46 = vld [vmem:[%s3413_s2 + $0x30] sm:$0xff]  ;;  %p2618_p12 = pnand %p2617_p11, %p2752_p5 }
  0x1c   : > { %2266 = vmatprep.subr.mxu0 %v256_v8  ;;  %p2625_p2 = por %p2624_p1, %p2623_p0 }
  0x1d   : > { %271 = vperm.xlu0 %2486, %v241_v9   ;;  %2267 = vmatpush3.msra.mxu0 %v256_v8  ;;  %p2619_p13 = pneg %p2618_p12 }
  0x1e   : > { %286 = vperm.xlu1 %2487, %v244_v10   ;;  %2268 = vmatprep.subr.mxu0 %v255_v11 }
  0x1f   : > { %2269 = vmatpush3.msra.mxu0 %v255_v11  ;;  %p2626_p3 = pnand %p2625_p2, %p2619_p13 }
  0x20   : > { %2271 = vmatmul.mubr.msk.f32.vlgmr.msra.gmra.mxu0 %vm319_vm0, %v224_v12 }
  0x21   : > { %2273 = vmatprep.mubr.msk.f32.mxu0 %vm319_vm0, %v225_v13 }
  0x22   : > { %296 = vperm.xlu1 %2487, %v246_v14  }
  0x24   : > { %2274 = vmatmul.mubr.msk.f32.gmra.mxu0 %vm319_vm0, %v226_v15 }
  0x25   : > { %2276 = vmatprep.mubr.msk.f32.mxu0 %vm319_vm0, %v227_v16 }
  0x28   : > { %2277 = vmatmul.mubr.msk.f32.gmra.mxu0 %vm319_vm0, %v228_v17 }
  0x29   : > { %2279 = vmatprep.mubr.msk.f32.mxu0 %vm319_vm0, %v229_v18 }
  0x2c   : > { %2280 = vmatmul.mubr.msk.f32.gmra.mxu0 %vm319_vm0, %v230_v19 }
  0x2d   : > { %2282 = vmatprep.mubr.msk.f32.mxu0 %vm319_vm0, %v231_v41 }
  0x30   : > { %2283 = vmatmul.mubr.msk.f32.gmra.mxu0 %vm319_vm0, %v232_v43 }
  0x31   : > { %2285 = vmatprep.mubr.msk.f32.mxu0 %vm319_vm0, %v233_v44 }
  0x34   : > { %2286 = vmatmul.mubr.msk.f32.gmra.mxu0 %vm319_vm0, %v234_v45 }
  0x90   : > { %v262_v20 = vpop.permute.xlu0 %261 }
  0x91   : > { %v282_v21 = vpop.permute.xlu1 %281 }
  0x94   : > { %v267_v22 = vpop.permute.xlu0 %266 }
  0x95   : > { %v277_v29 = vpop.permute.xlu1 %276 }
  0x98   : > { %v272_v39 = vpop.permute.xlu0 %271 }
  0x99   : > { %v287_v33 = vpop.permute.xlu1 %286 }
  0x9d   : > { %v297_v47 = vpop.permute.xlu1 %296 }
  0xe0   : > { %v2272_v23 = vpop.f32.mrf.mxu0 }
  0xe1   : > { %v428_v24 = vadd.f32 %v2272_v23, %v267_v22 }
  0xe2   : > { %v422_v25 = vpop.f32.mrf.mxu0 }
  0xe3   : > { %v482_v26 = vmul.f32 0.35355338, %v428_v24  ;;  %v423_v27 = vadd.f32 %v422_v25, %v262_v20 }
  0xe4   : > { %v2275_v28 = vpop.f32.mrf.mxu0 }
  0xe5   : > { %v481_v30 = vmul.f32 0.35355338, %v423_v27  ;;  %647 = vxpose.xlu1.b32.start.end [1/1] (short) (narrow) %v482_v26, 64  ;;  %v438_v37 = vadd.f32 %v2275_v28, %v277_v29 }
  0xe6   : > { %v432_v31 = vpop.f32.mrf.mxu0 }
  0xe7   : > { %485 = vxpose.xlu0.b32.start.end [1/1] (short) (narrow) %v481_v30, 64  ;;  %v484_v38 = vmul.f32 0.35355338, %v438_v37  ;;  %v433_v40 = vadd.f32 %v432_v31, %v272_v39 }
  0xe8   : > { %v2278_v32 = vpop.f32.mrf.mxu0 }
  0xe9   : > { %v448_v35 = vadd.f32 %v2278_v32, %v287_v33  ;;  %v483_v42 = vmul.f32 0.35355338, %v433_v40 }
  0xea   : > { %v442_v34 = vpop.f32.mrf.mxu0 }
  0xeb   : > { %v443_v36 = vadd.f32 %v442_v34, %v282_v21 }
  0xec   : > { %v2281_v50 = vpop.f32.mrf.mxu0 }
  0xed   : > { %2288 = vmatprep.subr.mxu1 %v443_v36  ;;  %v458_v53 = vadd.f32 %v2281_v50, %v297_v47 }
  0xee   : > { %2289 = vmatpush3.msra.mxu1 %v443_v36  ;;  %v452_v11 = vpop.f32.mrf.mxu0 }
  0xef   : > { %2302 = vmatprep.subr.mxu1 %v448_v35 }
 0x102   : > { %969 = vxpose.xlu1.b32.start.end [1/1] (short) (narrow) %v484_v38, 64 }
 0x11f   : > { %808 = vxpose.xlu1.b32.start.end [1/1] (short) (narrow) %v483_v42, 64 }
 0x12c   : > { %291 = vperm.xlu0 %2486, %v245_v46  }
 0x161   : > { %v663_v48 = vpop.trf.xlu1 }
 0x163   : > { %v501_v49 = vpop.trf.xlu0 }
 0x164   : > { %2290 = vmatprep.mubr.msk.f32.mxu1 %vm517_vm1, %v501_v49  ;;  %v2927_v49 = vpop.f32.mrf.mxu0 }
 0x165   : > { %v664_v51 = vpop.trf.xlu1 }
 0x167   : > { %v502_v52 = vpop.trf.xlu0 }
 0x168   : > { %2291 = vmatmul.mubr.msk.f32.vlgmr.msra.gmra.mxu1 %vm517_vm1, %v502_v52  ;;  %v2933_v52 = vpop.f32.mrf.mxu0 }
 0x169   : > { %2303 = vmatpush3.msra.mxu1 %v448_v35  ;;  %v665_v54 = vpop.trf.xlu1 }
 0x16a   : > { %2330 = vmatprep.subr.mxu1 %v458_v53 }
 0x16b   : > { %v503_v55 = vpop.trf.xlu0 }
 0x16c   : > { %2293 = vmatprep.mubr.msk.f32.mxu1 %vm517_vm1, %v503_v55  ;;  %v2939_v55 = vpop.f32.mrf.mxu0 }
 0x16d   : > { %v666_v56 = vpop.trf.xlu1 }
 0x16f   : > { %v504_v57 = vpop.trf.xlu0 }
 0x170   : > { %2294 = vmatmul.mubr.msk.f32.gmra.mxu1 %vm517_vm1, %v504_v57 }
 0x171   : > { %v667_v58 = vpop.trf.xlu1 }
 0x173   : > { %v505_v59 = vpop.trf.xlu0 }
 0x174   : > { %2296 = vmatprep.mubr.msk.f32.mxu1 %vm517_vm1, %v505_v59 }
 0x175   : > { %v668_v60 = vpop.trf.xlu1 }
 0x177   : > { %v506_v61 = vpop.trf.xlu0 }
 0x178   : > { %2297 = vmatmul.mubr.msk.f32.gmra.mxu1 %vm517_vm1, %v506_v61 }
 0x179   : > { %v669_v62 = vpop.trf.xlu1 }
 0x17b   : > { %v507_v63 = vpop.trf.xlu0 }
 0x17c   : > { %2299 = vmatprep.mubr.msk.f32.mxu1 %vm517_vm1, %v507_v63 }
 0x17d   : > { %v670_v0 = vpop.trf.xlu1 }
 0x17f   : > { %v508_v1 = vpop.trf.xlu0 }
 0x180   : > { %2300 = vmatmul.mubr.msk.f32.gmra.mxu1 %vm517_vm1, %v508_v1 }
 0x181   : > { %v985_v2 = vpop.trf.xlu1  ;;  %2304 = vmatprep.mubr.msk.f32.mxu1 %vm517_vm1, %v663_v48 }
 0x184   : > { %2305 = vmatmul.mubr.msk.f32.vlgmr.msra.gmra.mxu1 %vm517_vm1, %v664_v51 }
 0x185   : > { %2331 = vmatpush3.msra.mxu1 %v458_v53  ;;  %v986_v3 = vpop.trf.xlu1  ;;  %2307 = vmatprep.mubr.msk.f32.mxu1 %vm517_vm1, %v665_v54 }
 0x188   : > { %2308 = vmatmul.mubr.msk.f32.gmra.mxu1 %vm517_vm1, %v666_v56 }
 0x189   : > { %v987_v4 = vpop.trf.xlu1  ;;  %2310 = vmatprep.mubr.msk.f32.mxu1 %vm517_vm1, %v667_v58  ;;  %v2945_v58 = vpop.f32.mrf.mxu0 }
 0x18c   : > { %2311 = vmatmul.mubr.msk.f32.gmra.mxu1 %vm517_vm1, %v668_v60 }
 0x18d   : > { %v988_v5 = vpop.trf.xlu1  ;;  %2313 = vmatprep.mubr.msk.f32.mxu1 %vm517_vm1, %v669_v62 }
 0x190   : > { %2314 = vmatmul.mubr.msk.f32.gmra.mxu1 %vm517_vm1, %v670_v0 }
 0x191   : > { %v989_v6 = vpop.trf.xlu1  ;;  %2332 = vmatprep.mubr.msk.f32.mxu1 %vm517_vm1, %v985_v2 }
 0x194   : > { %2333 = vmatmul.mubr.msk.f32.vlgmr.msra.gmra.mxu1 %vm517_vm1, %v986_v3 }
 0x195   : > { %v990_v7 = vpop.trf.xlu1  ;;  %2335 = vmatprep.mubr.msk.f32.mxu1 %vm517_vm1, %v987_v4 }
 0x198   : > { %2336 = vmatmul.mubr.msk.f32.gmra.mxu1 %vm517_vm1, %v988_v5 }
 0x199   : > { %v991_v8 = vpop.trf.xlu1  ;;  %2338 = vmatprep.mubr.msk.f32.mxu1 %vm517_vm1, %v989_v6 }
 0x19c   : > { %2339 = vmatmul.mubr.msk.f32.gmra.mxu1 %vm517_vm1, %v990_v7 }
 0x19d   : > { %v992_v9 = vpop.trf.xlu1  ;;  %2341 = vmatprep.mubr.msk.f32.mxu1 %vm517_vm1, %v991_v8 }
 0x1a0   : > { %2342 = vmatmul.mubr.msk.f32.gmra.mxu1 %vm517_vm1, %v992_v9 }
 0x1a1   : > { %v824_v10 = vpop.trf.xlu1 }
 0x1a2   : > { %2318 = vmatprep.mubr.msk.f32.mxu0 %vm517_vm1, %v824_v10 }
 0x1a5   : > { %v825_v12 = vpop.trf.xlu1 }
 0x1a7   : > { %v292_v13 = vpop.permute.xlu0 %291 }
 0x1a8   : > { %v453_v14 = vadd.f32 %v452_v11, %v292_v13 }
 0x1a9   : > { %v826_v15 = vpop.trf.xlu1 }
 0x1aa   : > { %2316 = vmatprep.subr.mxu0 %v453_v14 }
 0x1ab   : > { %2317 = vmatpush3.msra.mxu0 %v453_v14 }
 0x1ac   : > { %2319 = vmatmul.mubr.msk.f32.vlgmr.msra.gmra.mxu0 %vm517_vm1, %v825_v12 }
 0x1ad   : > { %v827_v16 = vpop.trf.xlu1  ;;  %2321 = vmatprep.mubr.msk.f32.mxu0 %vm517_vm1, %v826_v15 }
 0x1b0   : > { %2322 = vmatmul.mubr.msk.f32.gmra.mxu0 %vm517_vm1, %v827_v16 }
 0x1b1   : > { %v828_v17 = vpop.trf.xlu1 }
 0x1b2   : > { %2324 = vmatprep.mubr.msk.f32.mxu0 %vm517_vm1, %v828_v17 }
 0x1b5   : > { %v829_v18 = vpop.trf.xlu1 }
 0x1b6   : > { %2325 = vmatmul.mubr.msk.f32.gmra.mxu0 %vm517_vm1, %v829_v18 }
 0x1b9   : > { %v830_v19 = vpop.trf.xlu1 }
 0x1ba   : > { %2327 = vmatprep.mubr.msk.f32.mxu0 %vm517_vm1, %v830_v19 }
 0x1bd   : > { %v831_v20 = vpop.trf.xlu1 }
 0x1be   : > { %2328 = vmatmul.mubr.msk.f32.gmra.mxu0 %vm517_vm1, %v831_v20 }
 0x228   : > { %v2871_v21 = vpop.f32.mrf.mxu1 }
 0x229   : > { %v1134_v22 = vsel %vm1130_vm2, %v2871_v21, -inf }
 0x22a   : > { %1135 = vmax.xlane.f32.xlu1 %v1134_v22  ;;  %v2875_v23 = vpop.f32.mrf.mxu1 }
 0x22b   : > { %v1131_v24 = vsel %vm1130_vm2, %v2875_v23, -inf }
 0x22e   : > { %1132 = vmax.xlane.f32.xlu1 %v1131_v24 }
 0x230   : > { %v2879_v25 = vpop.f32.mrf.mxu1 }
 0x231   : > { %v1140_v26 = vsel %vm1130_vm2, %v2879_v25, -inf }
 0x232   : > { %1141 = vmax.xlane.f32.xlu0 %v1140_v26  ;;  %v2883_v27 = vpop.f32.mrf.mxu1 }
 0x233   : > { %v1137_v28 = vsel %vm1130_vm2, %v2883_v27, -inf }
 0x236   : > { %1138 = vmax.xlane.f32.xlu0 %v1137_v28 }
 0x238   : > { %v2887_v29 = vpop.f32.mrf.mxu1 }
 0x239   : > { %v1146_v30 = vsel %vm1130_vm2, %v2887_v29, -inf }
 0x23a   : > { %1147 = vmax.xlane.f32.xlu0 %v1146_v30  ;;  %v2891_v31 = vpop.f32.mrf.mxu1 }
 0x23b   : > { %v1143_v32 = vsel %vm1130_vm2, %v2891_v31, -inf }
 0x23e   : > { %1144 = vmax.xlane.f32.xlu0 %v1143_v32 }
 0x240   : > { %v2895_v33 = vpop.f32.mrf.mxu1 }
 0x241   : > { %v1152_v14 = vsel %vm1130_vm2, %v2895_v33, -inf }
 0x242   : > { %v2897_v34 = vpop.f32.mrf.mxu1 }
 0x243   : > { %v1149_v35 = vsel %vm1130_vm2, %v2897_v34, -inf }
 0x244   : > { %1150 = vmax.xlane.f32.xlu0 %v1149_v35  ;;  %v2901_v36 = vpop.f32.mrf.mxu1 }
 0x245   : > { %v1158_v37 = vsel %vm1130_vm2, %v2901_v36, -inf }
 0x246   : > { %v2905_v38 = vpop.f32.mrf.mxu1 }
 0x247   : > { %v1155_v39 = vsel %vm1130_vm2, %v2905_v38, -inf }
 0x248   : > { %1159 = vmax.xlane.f32.xlu0 %v1158_v37  ;;  %v2909_v40 = vpop.f32.mrf.mxu1 }
 0x249   : > { %v1164_v41 = vsel %vm1130_vm2, %v2909_v40, -inf }
 0x24a   : > { %v2913_v42 = vpop.f32.mrf.mxu1 }
 0x24b   : > { %v1161_v43 = vsel %vm1130_vm2, %v2913_v42, -inf }
 0x24c   : > { %1156 = vmax.xlane.f32.xlu0 %v1155_v39  ;;  %v2917_v44 = vpop.f32.mrf.mxu1 }
 0x24d   : > { %v1170_v45 = vsel %vm1130_vm2, %v2917_v44, -inf }
 0x24e   : > { %v2921_v46 = vpop.f32.mrf.mxu1 }
 0x24f   : > { %v1167_v47 = vsel %vm1130_vm2, %v2921_v46, -inf }
 0x250   : > { %1165 = vmax.xlane.f32.xlu0 %v1164_v41  ;;  %v2925_v48 = vpop.f32.mrf.mxu1 }
 0x251   : > { %v1176_v50 = vsel %vm1130_vm2, %v2925_v48, -inf }
 0x252   : > { %v2931_v51 = vpop.f32.mrf.mxu1 }
 0x253   : > { %v1173_v53 = vsel %vm1130_vm2, %v2931_v51, -inf }
 0x254   : > { %1162 = vmax.xlane.f32.xlu0 %v1161_v43  ;;  %v2937_v54 = vpop.f32.mrf.mxu1 }
 0x255   : > { %v1206_v56 = vsel %vm1130_vm2, %v2937_v54, -inf }
 0x256   : > { %v2943_v57 = vpop.f32.mrf.mxu1 }
 0x257   : > { %v1203_v59 = vsel %vm1130_vm2, %v2943_v57, -inf }
 0x258   : > { %1171 = vmax.xlane.f32.xlu0 %v1170_v45  ;;  %v2949_v60 = vpop.f32.mrf.mxu1 }
 0x259   : > { %v1212_v63 = vsel %vm1130_vm2, %v2949_v60, -inf }
 0x25a   : > { %v2957_v0 = vpop.f32.mrf.mxu1 }
 0x25b   : > { %v1209_v2 = vsel %vm1130_vm2, %v2957_v0, -inf }
 0x25c   : > { %1168 = vmax.xlane.f32.xlu0 %v1167_v47  ;;  %v2963_v3 = vpop.f32.mrf.mxu1 }
 0x25d   : > { %v1218_v6 = vsel %vm1130_vm2, %v2963_v3, -inf }
 0x25e   : > { %v2973_v8 = vpop.f32.mrf.mxu1 }
 0x25f   : > { %v1215_v10 = vsel %vm1130_vm2, %v2973_v8, -inf }
 0x260   : > { %1177 = vmax.xlane.f32.xlu0 %v1176_v50  ;;  %v2981_v12 = vpop.f32.mrf.mxu1 }
 0x261   : > { %v1224_v13 = vsel %vm1130_vm2, %v2981_v12, -inf }
 0x262   : > { %v2987_v15 = vpop.f32.mrf.mxu1 }
 0x263   : > { %v1221_v16 = vsel %vm1130_vm2, %v2987_v15, -inf }
 0x264   : > { %1174 = vmax.xlane.f32.xlu0 %v1173_v53 }
 0x268   : > { %1207 = vmax.xlane.f32.xlu0 %v1206_v56 }
 0x26c   : > { %1204 = vmax.xlane.f32.xlu0 %v1203_v59  ;;  %v2951_v61 = vpop.f32.mrf.mxu0 }
 0x26d   : > { %v1182_v19 = vsel %vm1130_vm2, %v2951_v61, -inf }
 0x26e   : > { %v2953_v62 = vpop.f32.mrf.mxu0 }
 0x26f   : > { %v1179_v22 = vsel %vm1130_vm2, %v2953_v62, -inf }
 0x270   : > { %1213 = vmax.xlane.f32.xlu0 %v1212_v63  ;;  %v2959_v1 = vpop.f32.mrf.mxu0 }
 0x271   : > { %v1188_v17 = vsel %vm1130_vm2, %v2959_v1, -inf }
 0x272   : > { %v2965_v4 = vpop.f32.mrf.mxu0 }
 0x273   : > { %v1185_v18 = vsel %vm1130_vm2, %v2965_v4, -inf }
 0x274   : > { %1210 = vmax.xlane.f32.xlu0 %v1209_v2 }
 0x276   : > { %v2967_v5 = vpop.f32.mrf.mxu0 }
 0x277   : > { %v1194_v7 = vsel %vm1130_vm2, %v2967_v5, -inf }
 0x278   : > { %1219 = vmax.xlane.f32.xlu0 %v1218_v6  ;;  %1195 = vmax.xlane.f32.xlu1 %v1194_v7  ;;  %v2975_v9 = vpop.f32.mrf.mxu0 }
 0x279   : > { %v1191_v11 = vsel %vm1130_vm2, %v2975_v9, -inf }
 0x27c   : > { %1216 = vmax.xlane.f32.xlu0 %v1215_v10  ;;  %1192 = vmax.xlane.f32.xlu1 %v1191_v11 }
 0x27e   : > { %v2997_v20 = vpop.f32.mrf.mxu0 }
 0x27f   : > { %v1200_v24 = vsel %vm1130_vm2, %v2997_v20, -inf }
 0x280   : > { %1225 = vmax.xlane.f32.xlu0 %v1224_v13  ;;  %1153 = vmax.xlane.f32.xlu1 %v1152_v14  ;;  %v3003_v26 = vpop.f32.mrf.mxu0 }
 0x281   : > { %v1197_v28 = vsel %vm1130_vm2, %v3003_v26, -inf }
 0x284   : > { %1222 = vmax.xlane.f32.xlu0 %v1221_v16  ;;  %1189 = vmax.xlane.f32.xlu1 %v1188_v17 }
 0x288   : > { %1186 = vmax.xlane.f32.xlu1 %v1185_v18 }
 0x28c   : > { %1183 = vmax.xlane.f32.xlu1 %v1182_v19 }
 0x290   : > { %1180 = vmax.xlane.f32.xlu1 %v1179_v22 }
 0x294   : > { %1201 = vmax.xlane.f32.xlu1 %v1200_v24 }
 0x298   : > { %1198 = vmax.xlane.f32.xlu1 %v1197_v28 }
 0x2b3   : > { %v1136_v30 = vpop.xlane.xlu1 %1135 }
 0x2b4   : > { %v1228_v32 = vsub.f32 %v2871_v21, %v1136_v30 }
 0x2b6   : > { %v1261_v35 = vmul.f32 1.442695, %v1228_v32 }
 0x2b7   : > { %v1133_v37 = vpop.xlane.xlu1 %1132 }
 0x2b8   : > { %2488 = vpow2.f32 %v1261_v35  ;;  %v1227_v39 = vsub.f32 %v2875_v23, %v1133_v37 }
 0x2ba   : > { %v1259_v41 = vmul.f32 1.442695, %v1227_v39 }
 0x2bb   : > { %v1142_v43 = vpop.xlane.xlu0 %1141 }
 0x2bc   : > { %2490 = vpow2.f32 %v1259_v41  ;;  %v1230_v45 = vsub.f32 %v2879_v25, %v1142_v43 }
 0x2be   : > { %v1265_v47 = vmul.f32 1.442695, %v1230_v45 }
 0x2bf   : > { %v1139_v50 = vpop.xlane.xlu0 %1138 }
 0x2c0   : > { %2492 = vpow2.f32 %v1265_v47  ;;  %v1229_v53 = vsub.f32 %v2883_v27, %v1139_v50 }
 0x2c2   : > { %v1263_v56 = vmul.f32 1.442695, %v1229_v53 }
 0x2c3   : > { %v1148_v7 = vpop.xlane.xlu0 %1147 }
 0x2c4   : > { %2494 = vpow2.f32 %v1263_v56  ;;  %v1232_v30 = vsub.f32 %v2887_v29, %v1148_v7 }
 0x2c5   : > { %v3011_v59 = vpop.eup %2488 }
 0x2c6   : > { %v1326_v21 = vsel %vm1130_vm2, %v3011_v59, 0.0  ;;  %v1269_v39 = vmul.f32 1.442695, %v1232_v30 }
 0x2c7   : > { %1327 = vadd.xlane.f32.xlu1 %v1326_v21  ;;  %v1145_v10 = vpop.xlane.xlu0 %1144 }
 0x2c8   : > { %v1231_v41 = vsub.f32 %v2891_v31, %v1145_v10 }
 0x2c9   : > { %v3015_v63 = vpop.eup %2490 }
 0x2ca   : > { %v1323_v23 = vsel %vm1130_vm2, %v3015_v63, 0.0  ;;  %v1267_v56 = vmul.f32 1.442695, %v1231_v41 }
 0x2cb   : > { %1324 = vadd.xlane.f32.xlu1 %v1323_v23 }
 0x2cd   : > { %v3019_v25 = vpop.eup %2492  ;;  %v1151_v11 = vpop.xlane.xlu0 %1150 }
 0x2ce   : > { %v1332_v2 = vsel %vm1130_vm2, %v3019_v25, 0.0 }
 0x2cf   : > { %1333 = vadd.xlane.f32.xlu1 %v1332_v2 }
 0x2d1   : > { %v3023_v27 = vpop.eup %2494  ;;  %v1160_v13 = vpop.xlane.xlu0 %1159 }
 0x2d2   : > { %v1329_v6 = vsel %vm1130_vm2, %v3023_v27, 0.0  ;;  %v1236_v43 = vsub.f32 %v2901_v36, %v1160_v13 }
 0x2d3   : > { %1330 = vadd.xlane.f32.xlu1 %v1329_v6 }
 0x2d4   : > { %v1277_v21 = vmul.f32 1.442695, %v1236_v43 }
 0x2d5   : > { %v1157_v14 = vpop.xlane.xlu0 %1156 }
 0x2d6   : > { %v1235_v29 = vsub.f32 %v2905_v38, %v1157_v14 }
 0x2d8   : > { %v1275_v31 = vmul.f32 1.442695, %v1235_v29 }
 0x2d9   : > { %v1166_v16 = vpop.xlane.xlu0 %1165 }
 0x2da   : > { %v1238_v36 = vsub.f32 %v2909_v40, %v1166_v16  ;;  %v1233_v40 = vsub.f32 %v2897_v34, %v1151_v11 }
 0x2dd   : > { %v1163_v17 = vpop.xlane.xlu0 %1162 }
 0x2de   : > { %v1237_v10 = vsub.f32 %v2913_v42, %v1163_v17 }
 0x2e0   : > { %v1279_v16 = vmul.f32 1.442695, %v1237_v10 }
 0x2e1   : > { %v1172_v18 = vpop.xlane.xlu0 %1171 }
 0x2e5   : > { %v3027_v22 = vpop.xlane.xlu0 %1168 }
 0x2e9   : > { %v3030_v32 = vpop.xlane.xlu0 %1177 }
 0x2ea   : > { %v1242_v43 = vsub.f32 %v2925_v48, %v3030_v32 }
 0x2ed   : > { %v3035_v47 = vpop.xlane.xlu0 %1174 }
 0x2ee   : > { %v1241_v29 = vsub.f32 %v2931_v51, %v3035_v47 }
 0x2f1   : > { %v3041_v2 = vpop.xlane.xlu0 %1207 }
 0x2f5   : > { %v3046_v13 = vpop.xlane.xlu0 %1204 }
 0x301   : > { %v1196_v19 = vpop.xlane.xlu1 %1195 }
 0x302   : > { %v1248_v23 = vsub.f32 %v2967_v5, %v1196_v19 }
 0x304   : > { %v1301_v6 = vmul.f32 1.442695, %v1248_v23 }
 0x305   : > { %v1193_v24 = vpop.xlane.xlu1 %1192 }
 0x306   : > { %v1247_v7 = vsub.f32 %v2975_v9, %v1193_v24  ;;  %v1240_v9 = vsub.f32 %v2917_v44, %v1172_v18  ;;  %v1239_v44 = vsub.f32 %v2921_v46, %v3027_v22 }
 0x308   : > { %v1299_v38 = vmul.f32 1.442695, %v1247_v7  ;;  %v1285_v30 = vmul.f32 1.442695, %v1240_v9  ;;  %v1283_v41 = vmul.f32 1.442695, %v1239_v44 }
 0x309   : > { %v1154_v28 = vpop.xlane.xlu1 %1153 }
 0x30a   : > { %v1234_v5 = vsub.f32 %v2895_v33, %v1154_v28  ;;  %v1271_v33 = vmul.f32 1.442695, %v1233_v40  ;;  %v1214_v28 = vpop.xlane.xlu0 %1213 }
 0x30c   : > { %v1273_v24 = vmul.f32 1.442695, %v1234_v5 }
 0x30d   : > { %v1190_v35 = vpop.xlane.xlu1 %1189 }
 0x30e   : > { %v1246_v37 = vsub.f32 %v2959_v1, %v1190_v35 }
 0x310   : > { %v1297_v45 = vmul.f32 1.442695, %v1246_v37 }
 0x311   : > { %v1187_v50 = vpop.xlane.xlu1 %1186 }
 0x312   : > { %2496 = vpow2.f32 %v1297_v45  ;;  %v1245_v53 = vsub.f32 %v2965_v4, %v1187_v50  ;;  %v1281_v4 = vmul.f32 1.442695, %v1238_v36  ;;  %v1211_v45 = vpop.xlane.xlu0 %1210  ;;  %v1254_v36 = vsub.f32 %v2949_v60, %v1214_v28 }
 0x313   : > { %2498 = vpow2.f32 %v1269_v39  ;;  %v1253_v10 = vsub.f32 %v2957_v0, %v1211_v45 }
 0x314   : > { %v1295_v1 = vmul.f32 1.442695, %v1245_v53 }
 0x316   : > { %2500 = vpow2.f32 %v1295_v1 }
 0x317   : > { %2502 = vpow2.f32 %v1267_v56  ;;  %v1289_v56 = vmul.f32 1.442695, %v1242_v43 }
 0x318   : > { %2504 = vpow2.f32 %v1277_v21  ;;  %v1220_v21 = vpop.xlane.xlu0 %1219 }
 0x319   : > { %2506 = vpow2.f32 %v1275_v31  ;;  %v1287_v31 = vmul.f32 1.442695, %v1241_v29  ;;  %v1256_v9 = vsub.f32 %v2963_v3, %v1220_v21 }
 0x31a   : > { %2508 = vpow2.f32 %v1301_v6 }
 0x31b   : > { %2510 = vpow2.f32 %v1281_v4  ;;  %v1313_v4 = vmul.f32 1.442695, %v1254_v36 }
 0x31c   : > { %2512 = vpow2.f32 %v1299_v38  ;;  %v1217_v5 = vpop.xlane.xlu0 %1216 }
 0x31d   : > { %2514 = vpow2.f32 %v1279_v16  ;;  %v1311_v16 = vmul.f32 1.442695, %v1253_v10  ;;  %v1255_v28 = vsub.f32 %v2973_v8, %v1217_v5 }
 0x31e   : > { %2516 = vpow2.f32 %v1273_v24 }
 0x31f   : > { %v3048_v14 = vpop.eup %2496  ;;  %2518 = vpow2.f32 %v1271_v33  ;;  %v1317_v33 = vmul.f32 1.442695, %v1256_v9  ;;  %v1315_v3 = vmul.f32 1.442695, %v1255_v28 }
 0x320   : > { %v3051_v19 = vpop.eup %2498  ;;  %v1380_v42 = vsel %vm1130_vm2, %v3048_v14, 0.0  ;;  %2520 = vpow2.f32 %v1285_v30  ;;  %v1226_v0 = vpop.xlane.xlu0 %1225 }
 0x321   : > { %1381 = vadd.xlane.f32.xlu1 %v1380_v42  ;;  %v1338_v34 = vsel %vm1130_vm2, %v3051_v19, 0.0  ;;  %2522 = vpow2.f32 %v1283_v41  ;;  %v1258_v44 = vsub.f32 %v2981_v12, %v1226_v0  ;;  %v248_v12 = vld [vmem:[%s3413_s2 + $0x48] sm:$0xff] }
 0x322   : > { %2524 = vpow2.f32 %v1289_v56 }
 0x323   : > { %v3056_v17 = vpop.eup %2500  ;;  %2526 = vpow2.f32 %v1287_v31  ;;  %v1321_v43 = vmul.f32 1.442695, %v1258_v44 }
 0x324   : > { %v3060_v11 = vpop.eup %2502  ;;  %v1377_v18 = vsel %vm1130_vm2, %v3056_v17, 0.0  ;;  %2528 = vpow2.f32 %v1313_v4  ;;  %v1223_v41 = vpop.xlane.xlu0 %1222 }
 0x325   : > { %v3066_v35 = vpop.eup %2504  ;;  %1378 = vadd.xlane.f32.xlu0 %v1377_v18  ;;  %1339 = vadd.xlane.f32.xlu1 %v1338_v34  ;;  %v1335_v37 = vsel %vm1130_vm2, %v3060_v11, 0.0  ;;  %2530 = vpow2.f32 %v1311_v16  ;;  %v1257_v8 = vsub.f32 %v2987_v15, %v1223_v41 }
 0x326   : > { %v3070_v39 = vpop.eup %2506  ;;  %v1350_v46 = vsel %vm1130_vm2, %v3066_v35, 0.0  ;;  %2532 = vpow2.f32 %v1317_v33  ;;  %v1252_v33 = vsub.f32 %v2937_v54, %v3041_v2 }
 0x327   : > { %v3076_v22 = vpop.eup %2508  ;;  %v1347_v50 = vsel %vm1130_vm2, %v3070_v39, 0.0  ;;  %2534 = vpow2.f32 %v1315_v3  ;;  %v1319_v56 = vmul.f32 1.442695, %v1257_v8 }
 0x328   : > { %v3080_v53 = vpop.eup %2510  ;;  %v1386_v48 = vsel %vm1130_vm2, %v3076_v22, 0.0  ;;  %2536 = vpow2.f32 %v1321_v43 }
 0x329   : > { %1336 = vadd.xlane.f32.xlu1 %v1335_v37  ;;  %1351 = vadd.xlane.f32.xlu0 %v1350_v46  ;;  %v3086_v32 = vpop.eup %2512  ;;  %v1356_v23 = vsel %vm1130_vm2, %v3080_v53, 0.0  ;;  %v3124_v46 = vpop.xlane.xlu1 %1183  ;;  %2538 = vpow2.f32 %v1319_v56 }
 0x32a   : > { %v3090_v1 = vpop.eup %2514  ;;  %v1383_v51 = vsel %vm1130_vm2, %v3086_v32, 0.0  ;;  %v1244_v8 = vsub.f32 %v2951_v61, %v3124_v46  ;;  %v251_v61 = vld [vmem:[%s3415_s4] sm:$0xff] }
 0x32b   : > { %v3095_v47 = vpop.eup %2516  ;;  %v1353_v6 = vsel %vm1130_vm2, %v3090_v1, 0.0 }
 0x32c   : > { %v3099_v7 = vpop.eup %2518  ;;  %v1344_v38 = vsel %vm1130_vm2, %v3095_v47, 0.0  ;;  %v1293_v56 = vmul.f32 1.442695, %v1244_v8 }
 0x32d   : > { %1387 = vadd.xlane.f32.xlu1 %v1386_v48  ;;  %1348 = vadd.xlane.f32.xlu0 %v1347_v50  ;;  %v3104_v60 = vpop.eup %2520  ;;  %v1341_v40 = vsel %vm1130_vm2, %v3099_v7, 0.0  ;;  %v1181_v15 = vpop.xlane.xlu1 %1180 }
 0x32e   : > { %v1362_v24 = vsel %vm1130_vm2, %v3104_v60, 0.0  ;;  %v3111_v42 = vpop.eup %2522  ;;  %v1243_v44 = vsub.f32 %v2953_v62, %v1181_v15  ;;  %v249_v15 = vld [vmem:[%s3413_s2 + $0x50] sm:$0xff] }
 0x32f   : > { %v1359_v34 = vsel %vm1130_vm2, %v3111_v42, 0.0  ;;  %v3116_v30 = vpop.eup %2524 }
 0x330   : > { %v1368_v18 = vsel %vm1130_vm2, %v3116_v30, 0.0  ;;  %v3121_v37 = vpop.eup %2526 }
 0x331   : > { %1384 = vadd.xlane.f32.xlu1 %v1383_v51  ;;  %1357 = vadd.xlane.f32.xlu0 %v1356_v23  ;;  %v1365_v45 = vsel %vm1130_vm2, %v3121_v37, 0.0  ;;  %v3128_v50 = vpop.eup %2528  ;;  %v2679_v23 = vmov 0.0   ;;  %v1202_v36 = vpop.xlane.xlu1 %1201 }
 0x332   : > { %v1404_v29 = vsel %vm1130_vm2, %v3128_v50, 0.0  ;;  %v3135_v48 = vpop.eup %2530  ;;  %2344 = vmatprep.subr.mxu0 %v2679_v23  ;;  %2363 = vmatprep.subr.mxu1 %v2679_v23 }
 0x333   : > { %v1401_v21 = vsel %vm1130_vm2, %v3135_v48, 0.0  ;;  %v3141_v31 = vpop.eup %2532  ;;  %2360 = vmatprep.mubr.msk.f32.mxu0 %vm2680_vm3, %v2679_v23  ;;  %2379 = vmatprep.mubr.msk.f32.mxu1 %vm2680_vm3, %v2679_v23 }
 0x334   : > { %v1410_v51 = vsel %vm1130_vm2, %v3141_v31, 0.0 }
 0x335   : > { %1345 = vadd.xlane.f32.xlu1 %v1344_v38  ;;  %1354 = vadd.xlane.f32.xlu0 %v1353_v6  ;;  %v3145_v6 = vpop.eup %2534  ;;  %v1250_v38 = vsub.f32 %v2997_v20, %v1202_v36  ;;  %v1199_v5 = vpop.xlane.xlu1 %1198  ;;  %v1309_v20 = vmul.f32 1.442695, %v1252_v33 }
 0x336   : > { %v1407_v4 = vsel %vm1130_vm2, %v3145_v6, 0.0  ;;  %v3149_v10 = vpop.eup %2536 }
 0x337   : > { %v3154_v16 = vpop.eup %2538  ;;  %v1305_v9 = vmul.f32 1.442695, %v1250_v38 }
 0x338   : > { %v1413_v0 = vsel %vm1130_vm2, %v3154_v16, 0.0 }
 0x339   : > { %1342 = vadd.xlane.f32.xlu1 %v1341_v40  ;;  %1363 = vadd.xlane.f32.xlu0 %v1362_v24  ;;  %v1416_v40 = vsel %vm1130_vm2, %v3149_v10, 0.0  ;;  %v1249_v24 = vsub.f32 %v3003_v26, %v1199_v5  ;;  %2540 = vpow2.f32 %v1305_v9  ;;  %v1291_v26 = vmul.f32 1.442695, %v1243_v44 }
 0x33b   : > { %v1303_v28 = vmul.f32 1.442695, %v1249_v24  ;;  %v253_v24 = vld [vmem:[%s3415_s4 + $0x10] sm:$0xff] }
 0x33d   : > { %1360 = vadd.xlane.f32.xlu0 %v1359_v34  ;;  %v1251_v34 = vsub.f32 %v2943_v57, %v3046_v13  ;;  %2542 = vpow2.f32 %v1303_v28  ;;  %v247_v57 = vld [vmem:[%s3413_s2 + $0x40] sm:$0xff] }
 0x33e   : > { %2544 = vpow2.f32 %v1309_v20 }
 0x33f   : > { %v1307_v3 = vmul.f32 1.442695, %v1251_v34 }
 0x341   : > { %1369 = vadd.xlane.f32.xlu0 %v1368_v18  ;;  %2546 = vpow2.f32 %v1307_v3 }
 0x342   : > { %2548 = vpow2.f32 %v1291_v26 }
 0x343   : > { %2550 = vpow2.f32 %v1293_v56 }
 0x345   : > { %1366 = vadd.xlane.f32.xlu0 %v1365_v45 }
 0x346   : > { %v3164_v18 = vpop.eup %2540 }
 0x347   : > { %v1392_v54 = vsel %vm1130_vm2, %v3164_v18, 0.0 }
 0x349   : > { %1405 = vadd.xlane.f32.xlu0 %v1404_v29 }
 0x34a   : > { %306 = vperm.xlu1 %2487, %v248_v12   ;;  %v3168_v2 = vpop.eup %2542 }
 0x34b   : > { %v1389_v62 = vsel %vm1130_vm2, %v3168_v2, 0.0  ;;  %v3179_v13 = vpop.eup %2544 }
 0x34c   : > { %v1398_v41 = vsel %vm1130_vm2, %v3179_v13, 0.0 }
 0x34d   : > { %1402 = vadd.xlane.f32.xlu0 %v1401_v21 }
 0x34e   : > { %v3183_v43 = vpop.eup %2546 }
 0x34f   : > { %v1395_v45 = vsel %vm1130_vm2, %v3183_v43, 0.0  ;;  %v3189_v12 = vpop.eup %2548 }
 0x350   : > { %v1371_v29 = vsel %vm1130_vm2, %v3189_v12, 0.0  ;;  %v3196_v21 = vpop.eup %2550  ;;  %v1328_v36 = vpop.xlane.xlu1 %1327 }
 0x351   : > { %1411 = vadd.xlane.f32.xlu0 %v1410_v51  ;;  %v1374_v46 = vsel %vm1130_vm2, %v3196_v21, 0.0  ;;  %v252_v51 = vld [vmem:[%s3415_s4 + $0x8] sm:$0xff] }
 0x354   : > { %v1325_v38 = vpop.xlane.xlu1 %1324 }
 0x355   : > { %1408 = vadd.xlane.f32.xlu0 %v1407_v4  ;;  %v254_v4 = vld [vmem:[%s3415_s4 + $0x18] sm:$0xff] }
 0x358   : > { %v1334_v5 = vpop.xlane.xlu1 %1333 }
 0x359   : > { %1417 = vadd.xlane.f32.xlu0 %v1416_v40  ;;  %v250_v40 = vld [vmem:[%s3413_s2 + $0x58] sm:$0xff] }
 0x35c   : > { %v1331_v9 = vpop.xlane.xlu1 %1330 }
 0x35d   : > { %1414 = vadd.xlane.f32.xlu0 %v1413_v0 }
 0x36e   : > { %1393 = vadd.xlane.f32.xlu1 %v1392_v54 }
 0x372   : > { %1390 = vadd.xlane.f32.xlu1 %v1389_v62 }
 0x373   : > { %301 = vperm.xlu0 %2486, %v247_v57  }
 0x376   : > { %1399 = vadd.xlane.f32.xlu1 %v1398_v41 }
 0x37a   : > { %1396 = vadd.xlane.f32.xlu1 %v1395_v45 }
 0x37e   : > { %1372 = vadd.xlane.f32.xlu1 %v1371_v29 }
 0x38f   : > { %311 = vperm.xlu1 %2487, %v249_v15  }
 0x392   : > { %1375 = vadd.xlane.f32.xlu0 %v1374_v46 }
 0x393   : > { %1873 = vperm.xlu1 %2487, %v251_v61  }
 0x397   : > { %1878 = vperm.xlu1 %2487, %v252_v51  }
 0x39b   : > { %1888 = vperm.xlu1 %2487, %v254_v4  }
 0x3a8   : > { %316 = vperm.xlu0 %2486, %v250_v40  }
 0x3aa   : > { %v3215_v0 = vpop.xlane.xlu1 %1381 }
 0x3ac   : > { %1883 = vperm.xlu0 %2486, %v253_v24  }
 0x3ae   : > { %v1340_v33 = vpop.xlane.xlu1 %1339  ;;  %v3217_v28 = vpop.xlane.xlu0 %1378 }
 0x3b2   : > { %v1337_v20 = vpop.xlane.xlu1 %1336  ;;  %v1352_v34 = vpop.xlane.xlu0 %1351 }
 0x3b6   : > { %v3219_v3 = vpop.xlane.xlu1 %1387  ;;  %v3221_v44 = vpop.xlane.xlu0 %1348 }
 0x3ba   : > { %v3223_v26 = vpop.xlane.xlu1 %1384  ;;  %v1358_v54 = vpop.xlane.xlu0 %1357 }
 0x3be   : > { %v1346_v57 = vpop.xlane.xlu1 %1345  ;;  %v1355_v62 = vpop.xlane.xlu0 %1354 }
 0x3bf   : > { %2552 = vrcp.f32 %v1346_v57 }
 0x3c2   : > { %v1343_v41 = vpop.xlane.xlu1 %1342  ;;  %v1364_v8 = vpop.xlane.xlu0 %1363 }
 0x3c3   : > { %2554 = vrcp.f32 %v1343_v41 }
 0x3c4   : > { %2556 = vrcp.f32 %v1340_v33 }
 0x3c5   : > { %2558 = vrcp.f32 %v1337_v20 }
 0x3c6   : > { %v1361_v45 = vpop.xlane.xlu0 %1360 }
 0x3ca   : > { %v1370_v56 = vpop.xlane.xlu0 %1369 }
 0x3cb   : > { %2560 = vrcp.f32 %v1370_v56 }
 0x3cc   : > { %v2553_v29 = vpop.eup %2552  ;;  %2562 = vrcp.f32 %v1334_v5 }
 0x3cd   : > { %v1458_v15 = vmul.f32 %v2553_v29, %v3095_v47 }
 0x3ce   : > { %v1367_v61 = vpop.xlane.xlu0 %1366 }
 0x3cf   : > { %2564 = vrcp.f32 %v1367_v61  ;;  %2345 = vmatpush3.xpose.msk.msra.mxu0 %vm1130_vm2, %v1458_v15 }
 0x3d0   : > { %v2555_v46 = vpop.eup %2554  ;;  %2566 = vrcp.f32 %v1331_v9  ;;  %2346 = vmatprep.subr.mxu0 %v2679_v23 }
 0x3d1   : > { %2568 = vrcp.f32 %v1364_v8  ;;  %v1457_v51 = vmul.f32 %v2555_v46, %v3099_v7  ;;  %v2557_v4 = vpop.eup %2556 }
 0x3d2   : > { %v3229_v40 = vpop.xlane.xlu0 %1405  ;;  %2570 = vrcp.f32 %v1328_v36  ;;  %v1456_v47 = vmul.f32 %v2557_v4, %v3051_v19  ;;  %v2559_v5 = vpop.eup %2558 }
 0x3d3   : > { %2347 = vmatpush3.xpose.msk.msra.mxu0 %vm1130_vm2, %v1457_v51  ;;  %2572 = vrcp.f32 %v1361_v45  ;;  %v1455_v7 = vmul.f32 %v2559_v5, %v3060_v11  ;;  %v307_v51 = vpop.permute.xlu1 %306 }
 0x3d4   : > { %2348 = vmatprep.subr.mxu0 %v2679_v23  ;;  %2574 = vrcp.f32 %v1325_v38 }
 0x3d5   : > { %2576 = vrcp.f32 %v1358_v54 }
 0x3d6   : > { %v3234_v24 = vpop.xlane.xlu0 %1402  ;;  %2578 = vrcp.f32 %v1355_v62 }
 0x3d7   : > { %2349 = vmatpush3.xpose.msk.msra.mxu0 %vm1130_vm2, %v1456_v47  ;;  %2580 = vrcp.f32 %v1352_v34  ;;  %v468_v47 = vadd.f32 %v2927_v49, %v307_v51 }
 0x3d8   : > { %v2561_v9 = vpop.eup %2560  ;;  %2350 = vmatprep.subr.mxu0 %v2679_v23  ;;  %2582 = vrcp.f32 %v3221_v44 }
 0x3d9   : > { %v1466_v33 = vmul.f32 %v2561_v9, %v3116_v30  ;;  %v2563_v36 = vpop.eup %2562 }
 0x3da   : > { %v1412_v20 = vpop.xlane.xlu0 %1411  ;;  %v1454_v38 = vmul.f32 %v2563_v36, %v3019_v25 }
 0x3db   : > { %2351 = vmatpush3.xpose.msk.msra.mxu0 %vm1130_vm2, %v1455_v7  ;;  %2364 = vmatpush3.xpose.msk.msra.mxu1 %vm1130_vm2, %v1466_v33 }
 0x3dc   : > { %v2565_v19 = vpop.eup %2564  ;;  %2352 = vmatprep.subr.mxu0 %v2679_v23  ;;  %2365 = vmatprep.subr.mxu1 %v2679_v23 }
 0x3dd   : > { %v2567_v57 = vpop.eup %2566  ;;  %v1465_v54 = vmul.f32 %v2565_v19, %v3121_v37 }
 0x3de   : > { %v2569_v11 = vpop.eup %2568  ;;  %v1409_v41 = vpop.xlane.xlu0 %1408  ;;  %v1453_v8 = vmul.f32 %v2567_v57, %v3023_v27 }
 0x3df   : > { %2353 = vmatpush3.xpose.msk.msra.mxu0 %vm1130_vm2, %v1454_v38  ;;  %2366 = vmatpush3.xpose.msk.msra.mxu1 %vm1130_vm2, %v1465_v54  ;;  %v2571_v30 = vpop.eup %2570  ;;  %v1464_v62 = vmul.f32 %v2569_v11, %v3104_v60 }
 0x3e0   : > { %2354 = vmatprep.subr.mxu0 %v2679_v23  ;;  %2367 = vmatprep.subr.mxu1 %v2679_v23  ;;  %v2573_v45 = vpop.eup %2572  ;;  %v1452_v56 = vmul.f32 %v2571_v30, %v3011_v59 }
 0x3e1   : > { %v2575_v37 = vpop.eup %2574  ;;  %v1463_v34 = vmul.f32 %v2573_v45, %v3111_v42 }
 0x3e2   : > { %v1418_v25 = vpop.xlane.xlu0 %1417  ;;  %v2577_v27 = vpop.eup %2576  ;;  %v1451_v60 = vmul.f32 %v2575_v37, %v3015_v63 }
 0x3e3   : > { %2355 = vmatpush3.xpose.msk.msra.mxu0 %vm1130_vm2, %v1453_v8  ;;  %2368 = vmatpush3.xpose.msk.msra.mxu1 %vm1130_vm2, %v1464_v62  ;;  %2584 = vrcp.f32 %v1418_v25  ;;  %v1462_v29 = vmul.f32 %v2577_v27, %v3080_v53  ;;  %v2579_v15 = vpop.eup %2578 }
 0x3e4   : > { %2356 = vmatprep.subr.mxu0 %v2679_v23  ;;  %2369 = vmatprep.subr.mxu1 %v2679_v23  ;;  %v1461_v59 = vmul.f32 %v2579_v15, %v3090_v1  ;;  %v2581_v42 = vpop.eup %2580  ;;  %v238_v15 = vld [vmem:[%s3414_s3 + $0x18] sm:$0xff] }
 0x3e5   : > { %v1460_v63 = vmul.f32 %v2581_v42, %v3066_v35  ;;  %v2583_v53 = vpop.eup %2582 }
 0x3e6   : > { %v1415_v44 = vpop.xlane.xlu0 %1414 }
 0x3e7   : > { %2357 = vmatpush3.xpose.msk.msra.mxu0 %vm1130_vm2, %v1452_v56  ;;  %2370 = vmatpush3.xpose.msk.msra.mxu1 %vm1130_vm2, %v1463_v34  ;;  %2586 = vrcp.f32 %v1415_v44 }
 0x3e8   : > { %2358 = vmatprep.subr.mxu0 %v2679_v23  ;;  %2371 = vmatprep.subr.mxu1 %v2679_v23  ;;  %2588 = vrcp.f32 %v1412_v20 }
 0x3e9   : > { %2590 = vrcp.f32 %v1409_v41 }
 0x3eb   : > { %2359 = vmatpush3.xpose.msk.msra.mxu0 %vm1130_vm2, %v1451_v60  ;;  %2372 = vmatpush3.xpose.msk.msra.mxu1 %vm1130_vm2, %v1462_v29  ;;  %v236_v29 = vld [vmem:[%s3414_s3 + $0x8] sm:$0xff] }
 0x3ec   : > { %2373 = vmatprep.subr.mxu1 %v2679_v23  ;;  %2382 = vmatprep.subr.mxu0 %v2679_v23 }
 0x3ee   : > { %v302_v61 = vpop.permute.xlu0 %301 }
 0x3ef   : > { %v463_v46 = vadd.f32 %v2933_v52, %v302_v61  ;;  %2374 = vmatpush3.xpose.msk.msra.mxu1 %vm1130_vm2, %v1461_v59  ;;  %v1459_v52 = vmul.f32 %v2583_v53, %v3070_v39 }
 0x3f0   : > { %2375 = vmatprep.subr.mxu1 %v2679_v23  ;;  %v2585_v1 = vpop.eup %2584 }
 0x3f1   : > { %2361 = vmatmul.mubr.msk.f32.vlgmr.msra.gmra.mxu0 %vm1130_vm2, %v463_v46  ;;  %v1482_v35 = vmul.f32 %v2585_v1, %v3149_v10 }
 0x3f2   : > { %2398 = vmatprep.mubr.msk.f32.mxu0 %vm2680_vm3, %v2679_v23 }
 0x3f3   : > { %2376 = vmatpush3.xpose.msk.msra.mxu1 %vm1130_vm2, %v1460_v63 }
 0x3f4   : > { %2377 = vmatprep.subr.mxu1 %v2679_v23  ;;  %v2587_v5 = vpop.eup %2586 }
 0x3f5   : > { %v1481_v49 = vmul.f32 %v2587_v5, %v3154_v16  ;;  %v2589_v39 = vpop.eup %2588 }
 0x3f6   : > { %v2591_v7 = vpop.eup %2590 }
 0x3f7   : > { %v1394_v4 = vpop.xlane.xlu1 %1393  ;;  %2378 = vmatpush3.xpose.msk.msra.mxu1 %vm1130_vm2, %v1459_v52 }
 0x3f8   : > { %2592 = vrcp.f32 %v1394_v4  ;;  %2401 = vmatprep.subr.mxu1 %v2679_v23 }
 0x3f9   : > { %2594 = vrcp.f32 %v3229_v40  ;;  %v1480_v40 = vmul.f32 %v2589_v39, %v3141_v31 }
 0x3fa   : > { %2380 = vmatmul.mubr.msk.f32.vlgmr.msra.gmra.mxu1 %vm1130_vm2, %v468_v47 }
 0x3fb   : > { %v1391_v9 = vpop.xlane.xlu1 %1390  ;;  %2402 = vmatpush3.xpose.msk.msra.mxu1 %vm1130_vm2, %v1482_v35  ;;  %2417 = vmatprep.mubr.msk.f32.mxu1 %vm2680_vm3, %v2679_v23 }
 0x3fc   : > { %2596 = vrcp.f32 %v1391_v9  ;;  %2403 = vmatprep.subr.mxu1 %v2679_v23 }
 0x3fd   : > { %2598 = vrcp.f32 %v3234_v24 }
 0x3fe   : > { %2600 = vrcp.f32 %v3219_v3  ;;  %v1479_v3 = vmul.f32 %v2591_v7, %v3145_v6 }
 0x3ff   : > { %v1400_v10 = vpop.xlane.xlu1 %1399  ;;  %2404 = vmatpush3.xpose.msk.msra.mxu1 %vm1130_vm2, %v1481_v49 }
 0x400   : > { %2405 = vmatprep.subr.mxu1 %v2679_v23  ;;  %2602 = vrcp.f32 %v1400_v10 }
 0x401   : > { %2604 = vrcp.f32 %v3223_v26 }
 0x403   : > { %v1397_v33 = vpop.xlane.xlu1 %1396  ;;  %2406 = vmatpush3.xpose.msk.msra.mxu1 %vm1130_vm2, %v1480_v40 }
 0x404   : > { %2407 = vmatprep.subr.mxu1 %v2679_v23  ;;  %2606 = vrcp.f32 %v1397_v33 }
 0x405   : > { %v2593_v16 = vpop.eup %2592  ;;  %2608 = vrcp.f32 %v3215_v0 }
 0x406   : > { %v2595_v24 = vpop.eup %2594  ;;  %v1474_v36 = vmul.f32 %v2593_v16, %v3164_v18  ;;  %2610 = vrcp.f32 %v3217_v28 }
 0x407   : > { %2408 = vmatpush3.xpose.msk.msra.mxu1 %vm1130_vm2, %v1479_v3  ;;  %v1478_v26 = vmul.f32 %v2595_v24, %v3128_v50 }
 0x408   : > { %2383 = vmatpush3.xpose.msk.msra.mxu0 %vm1130_vm2, %v1474_v36  ;;  %2409 = vmatprep.subr.mxu1 %v2679_v23 }
 0x409   : > { %v2597_v31 = vpop.eup %2596  ;;  %2384 = vmatprep.subr.mxu0 %v2679_v23 }
 0x40a   : > { %v2599_v20 = vpop.eup %2598  ;;  %v1473_v6 = vmul.f32 %v2597_v31, %v3168_v2 }
 0x40b   : > { %v2601_v19 = vpop.eup %2600  ;;  %2410 = vmatpush3.xpose.msk.msra.mxu1 %vm1130_vm2, %v1478_v26  ;;  %v1477_v18 = vmul.f32 %v2599_v20, %v3135_v48 }
 0x40c   : > { %2385 = vmatpush3.xpose.msk.msra.mxu0 %vm1130_vm2, %v1473_v6  ;;  %2411 = vmatprep.subr.mxu1 %v2679_v23  ;;  %v1472_v57 = vmul.f32 %v2601_v19, %v3076_v22 }
 0x40d   : > { %2386 = vmatprep.subr.mxu0 %v2679_v23  ;;  %v2603_v0 = vpop.eup %2602 }
 0x40e   : > { %v2605_v50 = vpop.eup %2604  ;;  %v1476_v2 = vmul.f32 %v2603_v0, %v3179_v13  ;;  %v1373_v13 = vpop.xlane.xlu1 %1372 }
 0x40f   : > { %2412 = vmatpush3.xpose.msk.msra.mxu1 %vm1130_vm2, %v1477_v18  ;;  %v1471_v38 = vmul.f32 %v2605_v50, %v3086_v32 }
 0x410   : > { %2387 = vmatpush3.xpose.msk.msra.mxu0 %vm1130_vm2, %v1472_v57  ;;  %2413 = vmatprep.subr.mxu1 %v2679_v23 }
 0x411   : > { %2388 = vmatprep.subr.mxu0 %v2679_v23  ;;  %v2607_v28 = vpop.eup %2606 }
 0x412   : > { %v2609_v54 = vpop.eup %2608  ;;  %v1475_v22 = vmul.f32 %v2607_v28, %v3183_v43 }
 0x413   : > { %2414 = vmatpush3.xpose.msk.msra.mxu1 %vm1130_vm2, %v1476_v2  ;;  %v1470_v48 = vmul.f32 %v2609_v54, %v3048_v14  ;;  %v2611_v11 = vpop.eup %2610 }
 0x414   : > { %2389 = vmatpush3.xpose.msk.msra.mxu0 %vm1130_vm2, %v1471_v38  ;;  %2415 = vmatprep.subr.mxu1 %v2679_v23  ;;  %v1469_v32 = vmul.f32 %v2611_v11, %v3056_v17  ;;  %v312_v17 = vpop.permute.xlu1 %311 }
 0x415   : > { %2390 = vmatprep.subr.mxu0 %v2679_v23  ;;  %v473_v25 = vadd.f32 %v2945_v58, %v312_v17 }
 0x417   : > { %2416 = vmatpush3.xpose.msk.msra.mxu1 %vm1130_vm2, %v1475_v22 }
 0x418   : > { %2391 = vmatpush3.xpose.msk.msra.mxu0 %vm1130_vm2, %v1470_v48  ;;  %v1874_v44 = vpop.permute.xlu1 %1873 }
 0x419   : > { %2392 = vmatprep.subr.mxu0 %v2679_v23 }
 0x41b   : > { %v1376_v41 = vpop.xlane.xlu0 %1375 }
 0x41c   : > { %2612 = vrcp.f32 %v1376_v41  ;;  %2393 = vmatpush3.xpose.msk.msra.mxu0 %vm1130_vm2, %v1469_v32  ;;  %v1879_v59 = vpop.permute.xlu1 %1878 }
 0x41d   : > { %2394 = vmatprep.subr.mxu0 %v2679_v23  ;;  %2614 = vrcp.f32 %v1373_v13 }
 0x420   : > { %v1889_v42 = vpop.permute.xlu1 %1888 }
 0x423   : > { %v317_v43 = vpop.permute.xlu0 %316 }
 0x424   : > { %v478_v14 = vadd.f32 %v2939_v55, %v317_v43  ;;  %v235_v55 = vld [vmem:[%s3414_s3] sm:$0xff] }
 0x426   : > { %2418 = vmatmul.mubr.msk.f32.vlgmr.msra.gmra.mxu1 %vm1130_vm2, %v478_v14 }
 0x427   : > { %v1884_v63 = vpop.permute.xlu0 %1883 }
 0x429   : > { %v2613_v30 = vpop.eup %2612 }
 0x42a   : > { %v1468_v8 = vmul.f32 %v2613_v30, %v3196_v21  ;;  %v2615_v62 = vpop.eup %2614  ;;  %v237_v21 = vld [vmem:[%s3414_s3 + $0x10] sm:$0xff] }
 0x42b   : > { %v1467_v45 = vmul.f32 %v2615_v62, %v3189_v12  ;;  %2431 = vmatprep.mubr.msk.f32.mxu1 %vm319_vm0, %v237_v21 }
 0x42c   : > { %2395 = vmatpush3.xpose.msk.msra.mxu0 %vm1130_vm2, %v1468_v8 }
 0x42d   : > { %2396 = vmatprep.subr.mxu0 %v2679_v23 }
 0x430   : > { %2397 = vmatpush3.xpose.msk.msra.mxu0 %vm1130_vm2, %v1467_v45 }
 0x433   : > { %2399 = vmatmul.mubr.msk.f32.vlgmr.msra.gmra.mxu0 %vm1130_vm2, %v473_v25 }
 0x434   : > { %2428 = vmatprep.mubr.msk.f32.mxu0 %vm319_vm0, %v235_v55 }
 0x4b1   : > { %v1576_v23 = vpop.f32.mrf.mxu0 }
 0x4b3   : > { %v2362_v12 = vpop.f32.mrf.mxu0 }
 0x4ba   : > { %v1673_v37 = vpop.f32.mrf.mxu1 }
 0x4bc   : > { %v2381_v56 = vpop.f32.mrf.mxu1 }
 0x4e6   : > { %v1867_v34 = vpop.f32.mrf.mxu1 }
 0x4e7   : > { %2420 = vmatprep.subr.mxu0 %v1867_v34  ;;  %2434 = vmatprep.subr.mxu1 %v1867_v34 }
 0x4e8   : > { %v2419_v58 = vpop.f32.mrf.mxu1  ;;  %2421 = vmatpush3.msra.mxu0 %v1867_v34  ;;  %2438 = vmatpush3.msra.mxu1 %v1867_v34 }
 0x4f3   : > { %v1770_v27 = vpop.f32.mrf.mxu0 }
 0x4f4   : > { %2422 = vmatprep.subr.mxu0 %v1770_v27  ;;  %2435 = vmatprep.subr.mxu1 %v1770_v27 }
 0x4f5   : > { %v2400_v60 = vpop.f32.mrf.mxu0  ;;  %2423 = vmatpush3.msra.mxu0 %v1770_v27  ;;  %2439 = vmatpush3.msra.mxu1 %v1770_v27 }
 0x4f6   : > { %2424 = vmatprep.subr.mxu0 %v1673_v37  ;;  %2436 = vmatprep.subr.mxu1 %v1673_v37 }
 0x4f7   : > { %2425 = vmatpush3.msra.mxu0 %v1673_v37  ;;  %2440 = vmatpush3.msra.mxu1 %v1673_v37 }
 0x4f8   : > { %2426 = vmatprep.subr.mxu0 %v1576_v23  ;;  %2437 = vmatprep.subr.mxu1 %v1576_v23 }
 0x4f9   : > { %2427 = vmatpush3.msra.mxu0 %v1576_v23  ;;  %2441 = vmatpush3.msra.mxu1 %v1576_v23 }
 0x4fa   : > { %2429 = vmatmul.mubr.msk.f32.vlgmr.msra.gmra.mxu0 %vm319_vm0, %v236_v29  ;;  %2432 = vmatmul.mubr.msk.f32.vlgmr.msra.gmra.mxu1 %vm319_vm0, %v238_v15 }
 0x5ba   : > { %v2430_v61 = vpop.f32.mrf.mxu0  ;;  %v2433_v46 = vpop.f32.mrf.mxu1 }
 0x5bb   : > { %v1975_v53 = vadd.f32 %v2430_v61, %v1879_v59  ;;  %v1985_v51 = vadd.f32 %v2433_v46, %v1889_v42 }
 0x5bc   : > { %v1969_v52 = vpop.f32.mrf.mxu0  ;;  %v1979_v1 = vpop.f32.mrf.mxu1 }
 0x5bd   : > { %1989 = vst.msk [vmem:[%s217_s12 + $0x8] sm:$0xff] %vm1130_vm2, %v1975_v53  ;;  %1991 = vst.msk [vmem:[%s217_s12 + $0x18] sm:$0xff] %vm1130_vm2, %v1985_v51  ;;  %v1970_v4 = vadd.f32 %v1969_v52, %v1874_v44  ;;  %v1980_v47 = vadd.f32 %v1979_v1, %v1884_v63 }
 0x5bf   : > { %1988 = vst.msk [vmem:[%s217_s12] sm:$0xff] %vm1130_vm2, %v1970_v4  ;;  %1990 = vst.msk [vmem:[%s217_s12 + $0x10] sm:$0xff] %vm1130_vm2, %v1980_v47 }
 0x5c0   : > { %2629 = shalt.err (!%p2626_p3)
}
 0x5c1   : > { %s2630_s6 = scalar_lea.hbm %s3367_s22, 512  ;;  %s2634_s9 = scalar_lea.hbm %s3416_s5, 1024 }
 0x5c2   : > { %p2631_p4 = scmp.ne.s32.totalorder %s3367_s22, %s2630_s6  ;;  %p2635_p9 = scmp.lt.s32.totalorder %s3367_s22, %s3416_s5 }
 0x5c3   : > { %p2636_p10 = scmp.lt.s32.totalorder %s2634_s9, %s2630_s6 }
 0x5c4   : > { %p2632_p7 = pnand %p2631_p4, %p2752_p5 }
 0x5c5   : > { %p2637_p11 = por %p2636_p10, %p2635_p9 }
 0x5c6   : > { %p2633_p8 = pneg %p2632_p7 }
 0x5c8   : > { %p2638_p12 = pnand %p2637_p11, %p2633_p8 }
 0x5ca   : > { %2641 = shalt.err (!%p2638_p12)
}
 0x5cb   : > { %s2682_s12 = smov 128   ;;  %s2683_s14 = smov 8  }
 0x5cc   : > { %2442 = dma.vmem_to_hbm [thread:$0]  (%p2752_p5), %s3360_s13, 512, %s3367_s22, %s3371_s17, %s2682_s12, %s2682_s12, %s2683_s14  }
 0x5cd PF: > { %p2448_p13 = scmp.ge.s32.totalorder %s2676_s21, 2  ;;  %s2021_s15 = sand.u32 1, %s2664_s18  }
 0x5ce   : > { %s2022_s16 = scalar_lea.sflag [#allocation3], %s2021_s15 }
 0x5cf   : > { %p2445_p0 = pnand %p2448_p13, %p2756_p6 }
 0x5d1   : > { %p2446_p1 = pneg %p2445_p0 }
 0x5d3   : > { %2659 = dma.done.wait (%p2446_p1), %s2022_s16, 512  }
 0x5d4   : > { %2661 = vsyncadd (%p2446_p1), %s2022_s16, 4294966784  ;;  %p15_p2 = scmp.ge.s32.totalorder %s2739_s24, 4   ;;  %s3419_s18 = smov %s2668_s19 }
 0x5d5   : > { %s3420_s19 = smov %s2672_s20  ;;  %s3421_s20 = smov %s2750_s27 }
 0x5d6   : > { %s3422_s21 = smov %s2739_s24  ;;  %17 = sbr.rel (!%p15_p2) target bundleno = 3 (0x3), region = 75 }
 0x5db   :  { %2027 = vsyncpa [#allocation3], 1 }
 0x5dc   :  { %2029 = vsyncpa [#allocation3 + $0x1], 1 }

</bundles_post_ra>
